<compile_context>
chip_gen: v7x
topology: tpu7x:2x2x1
jax: 0.10.0
libtpu: 0.0.40
codegen_flags: <defaults>
</compile_context>

<pallas_src>
import functools

import jax
import jax.numpy as jnp
from jax.experimental import pallas as pl
from jax.experimental.pallas import tpu as pltpu


# ------------------------------ Pallas kernel --------------------------------
def ap_model1_kernel(y_ref, w_ref, out_ref, *, dimD, batch, bias):
    D, B = dimD, batch
    k = 8.0
    eps = 0.01

    y = y_ref[...]                                   # (B, 2D+1) = [u | v | par]
    u = y[:, 0:D]
    v = y[:, D:2 * D]
    par = y[:, 2 * D:2 * D + 1]                      # (B, 1) broadcasts over node axis

    # One MXU matmul gives [diffusion | graph conv]; the par column of y hits a
    # zero row of W_big so it does not pollute the linear terms.
    lin = jnp.dot(y, w_ref[...], preferred_element_type=jnp.float32)     # (B, 2D)
    mk_t = lin[:, 0:D]                               # (S @ u)^T, batch-major
    node_out = lin[:, D:2 * D]                       # per-sample conv, node n = b*D + d

    # torch.unflatten(out, 0, (D, B)) scrambles batch/node indices:
    #     out_t[b', d'] = node_out_flat[d' * B + b']      (cross-row permutation)
    # Flatten row-major via lane concat (slices + concat only), then pick the
    # permuted columns with iota-generated 0/1 selector matmuls (B is a static
    # Python int).  No reshape / transpose / gather on the critical path, and
    # no extra DMA'd constants.
    node_flat = jnp.concatenate([node_out[b:b + 1, :] for b in range(B)],
                                axis=1)                                   # (1, B*D)
    n_iota = jax.lax.broadcasted_iota(jnp.int32, (B * D, D), 0)          # flat node n
    d_iota = jax.lax.broadcasted_iota(jnp.int32, (B * D, D), 1)          # target col d'
    rows = []
    for bp in range(B):
        sel = (n_iota == d_iota * B + bp).astype(jnp.float32)            # (B*D, D)
        rows.append(jnp.dot(node_flat, sel,
                            preferred_element_type=jnp.float32))         # (1, D)
    out_t = jnp.concatenate(rows, axis=0) + bias                          # (B, D)

    pde1_t = mk_t + k * u * (1.0 - u) * (u - par) - out_t                 # (B, D)
    pde2_t = -eps * (k * u * (u - par - 1.0) + v)                         # (B, D)

    # Single store; last column is the zero padding torch appends.
    out_ref[...] = jnp.concatenate(
        [pde1_t, pde2_t, jnp.zeros((B, 1), jnp.float32)], axis=1)


# ------------------- init-time folding of module constants -------------------
def _spline_edge_weights(pseudo, weight, kernel_size):
    """Per-edge effective (in=2, out=1) weights for a degree-1 open B-spline.

    Parity note: the (kf+1) % K wrap differs from torch_spline_conv's clamped
    handling only at pseudo == 1.0 exactly, where the interpolation weight of
    the second index is 0 anyway (frac == 0 is impossible there for p < K-1).
    """
    p = pseudo[:, 0] * (kernel_size - 1)             # open spline scaling
    kf = jnp.floor(p)
    frac = p - kf
    kf = kf.astype(jnp.int32)
    idx0 = kf % kernel_size
    idx1 = (kf + 1) % kernel_size
    w_e = ((1.0 - frac)[:, None, None] * weight[idx0]
           + frac[:, None, None] * weight[idx1])     # (E, 2, 1)
    return w_e


def prepare_operators(consts, batch):
    """Fold SplineConv (edges/pseudo/weights are module constants) and the
    S-transpose into one dense operator consumed by the kernel's single matmul.
    Runs once at 'module init'.  When D is scaled up, store W_big in bfloat16
    (keep preferred_element_type=f32 in the kernel) to halve DMA bytes."""
    D = consts["dimD"]
    K = consts["kernel_size"]
    edges, pseudo = consts["edges"], consts["pseudo"]
    weight, root = consts["spline_weight"], consts["root"]
    src, dst = edges[0], edges[1]
    E = src.shape[0]

    w_e = _spline_edge_weights(pseudo, weight, K)    # (E, 2, 1)
    w_u, w_v = w_e[:, 0, 0], w_e[:, 1, 0]

    deg = jax.ops.segment_sum(jnp.ones((E,), jnp.float32), dst, num_segments=D)
    inv_deg = jnp.where(deg > 0, 1.0 / jnp.maximum(deg, 1.0), 0.0)            # mean aggr
    oh_dst = jax.nn.one_hot(dst, D, dtype=jnp.float32)                        # (E, D)
    oh_src = jax.nn.one_hot(src, D, dtype=jnp.float32)                        # (E, D)
    g_u = (oh_dst * w_u[:, None]).T @ oh_src * inv_deg[:, None]               # (D, D)
    g_v = (oh_dst * w_v[:, None]).T @ oh_src * inv_deg[:, None]               # (D, D)
    a_u = g_u + root[0, 0] * jnp.eye(D, dtype=jnp.float32)                    # + root weight
    a_v = g_v + root[1, 0] * jnp.eye(D, dtype=jnp.float32)

    # Per-sample conv operator: node_out[b, d] = sum_j [u_b | v_b][j] * wc[j, d].
    wc = jnp.concatenate([a_u.T, a_v.T], axis=0)                              # (2D, D)

    # Combined operator: y (B, 2D+1) @ W_big (2D+1, 2D) -> [ (S@u)^T | node_out ].
    # Columns 0:D apply S^T to the u rows; columns D:2D apply wc to [u | v];
    # the par row (index 2D) is zero.
    w_big = jnp.zeros((2 * D + 1, 2 * D), jnp.float32)
    w_big = w_big.at[0:D, 0:D].set(consts["S"].T)
    w_big = w_big.at[0:2 * D, D:2 * D].set(wc)

    return dict(W=w_big, bias=float(consts["spline_bias"][0]), dimD=D, batch=batch)


# ---------------------------------- wrapper ----------------------------------
def ap_model1_forward(t, y, ops):
    """Mirrors APModel1.forward(t, y).  t only bumps a step counter in torch."""
    del t
    B = y.shape[0]
    D = ops["dimD"]
    kernel = functools.partial(ap_model1_kernel, dimD=D, batch=B, bias=ops["bias"])

    vmem = pl.BlockSpec(memory_space=pltpu.MemorySpace.VMEM)
    return pl.pallas_call(
        kernel,
        out_shape=jax.ShapeDtypeStruct((B, 2 * D + 1), jnp.float32),
        in_specs=[vmem, vmem],
        out_specs=vmem,
    )(y, ops["W"])


# ----------------------------- pure-JAX reference ----------------------------
def _spline_conv_ref(x, edge_index, pseudo, weight, root, bias, num_nodes, K):
    """Edge-wise SplineConv (torch_spline_conv semantics: degree-1 open spline,
    mean aggregation, root weight, bias)."""
    src, dst = edge_index[0], edge_index[1]
    E = src.shape[0]
    w_e = _spline_edge_weights(pseudo, weight, K)                 # (E, 2, 1)
    msg = jnp.einsum('ei,eio->eo', x[src], w_e)                   # (E, 1)
    summ = jax.ops.segment_sum(msg, dst, num_segments=num_nodes)
    cnt = jax.ops.segment_sum(jnp.ones((E, 1), jnp.float32), dst, num_segments=num_nodes)
    aggr = jnp.where(cnt > 0, summ / jnp.maximum(cnt, 1.0), 0.0)
    return aggr + x @ root + bias


def reference_forward(t, y, consts, batch):
    """Op-for-op mirror of the torch APModel1.forward."""
    del t
    D = consts["dimD"]
    K = consts["kernel_size"]
    S = consts["S"]
    k, eps = 8.0, 0.01

    u = jnp.transpose(y[:, 0:D])                                  # (D, B)
    v = jnp.transpose(y[:, D:2 * D])                              # (D, B)
    par = jnp.squeeze(y[:, 2 * D:], axis=1)                       # (B,)
    MK = S @ u

    u1 = jnp.reshape(jnp.transpose(u), (1, -1))
    v1 = jnp.reshape(jnp.transpose(v), (1, -1))
    uv = jnp.concatenate([u1, v1], axis=0)                        # (2, B*D)

    # APModel1.expand: replicate graph across the batch with node offsets.
    ee = jnp.concatenate([consts["edges"] + b * D for b in range(batch)], axis=1)
    ep = jnp.concatenate([consts["pseudo"] for _ in range(batch)], axis=0)

    out_nn = _spline_conv_ref(jnp.transpose(uv), ee, ep, consts["spline_weight"],
                              consts["root"], consts["spline_bias"], batch * D, K)
    out = jnp.reshape(out_nn, (D, batch))                         # unflatten(0,(D,B)).squeeze()

    pde1 = MK + k * u * (1.0 - u) * (u - par) - out
    pde2 = -eps * (k * u * (u - par - 1.0) + v)
    val = jnp.transpose(jnp.concatenate([pde1, pde2], axis=0))    # (B, 2D)
    return jnp.concatenate([val, jnp.zeros((batch, 1), jnp.float32)], axis=1)


# ------------------------------------ main ------------------------------------
if __name__ == "__main__":
    batch, dimD, kernel_size = 2, 16, 5

    key = jax.random.PRNGKey(0)
    ks = jax.random.split(key, 6)

    # Bidirectional ring graph on dimD nodes (module-level constants).
    idx = jnp.arange(dimD, dtype=jnp.int32)
    src = jnp.concatenate([idx, idx])
    dst = jnp.concatenate([(idx + 1) % dimD, (idx - 1) % dimD])
    edges = jnp.stack([src, dst], axis=0)                               # (2, 32)
    pseudo = jax.random.uniform(ks[0], (edges.shape[1], 1), jnp.float32)

    S = 0.1 * jax.random.normal(ks[1], (dimD, dimD), jnp.float32)
    spline_weight = 0.5 * jax.random.normal(ks[2], (kernel_size, 2, 1), jnp.float32)
    root = 0.5 * jax.random.normal(ks[3], (2, 1), jnp.float32)
    spline_bias = 0.1 * jax.random.normal(ks[4], (1,), jnp.float32)

    # State vector y = [u | v | par] per batch row.
    y = jax.random.uniform(ks[5], (batch, 2 * dimD + 1), jnp.float32)
    t = jnp.float32(0.0)

    consts = dict(S=S, edges=edges, pseudo=pseudo, spline_weight=spline_weight,
                  root=root, spline_bias=spline_bias, dimD=dimD,
                  kernel_size=kernel_size)

    ops = prepare_operators(consts, batch)          # one-time init folding
    out = jax.block_until_ready(ap_model1_forward(t, y, ops))
    ref = jax.block_until_ready(reference_forward(t, y, consts, batch))

    assert out.shape == (batch, 2 * dimD + 1)
    assert jnp.allclose(out, ref, atol=1e-4, rtol=1e-4)
    print("KERNEL_OK")
</pallas_src>

<mosaic_0001>
module attributes {stable_mosaic.version = 11 : i64} {
  func.func @ap_model1_kernel(%arg0: memref<2x33xf32, #tpu.memory_space<vmem>>, %arg1: memref<33x32xf32, #tpu.memory_space<vmem>>, %arg2: memref<2x33xf32, #tpu.memory_space<vmem>>) attributes {dimension_semantics = [], scalar_prefetch = 0 : i64, scratch_operands = 0 : i64, tpu.core_type = #tpu.core_type<tc>} {
    %c0 = arith.constant 0 : index
    %c0_0 = arith.constant 0 : index
    %0 = vector.load %arg0[%c0, %c0_0] : memref<2x33xf32, #tpu.memory_space<vmem>>, vector<2x33xf32>
    %1 = vector.extract_strided_slice %0 {offsets = [0, 0], sizes = [2, 16], strides = [1, 1]} : vector<2x33xf32> to vector<2x16xf32>
    %2 = vector.extract_strided_slice %0 {offsets = [0, 16], sizes = [2, 16], strides = [1, 1]} : vector<2x33xf32> to vector<2x16xf32>
    %3 = vector.extract_strided_slice %0 {offsets = [0, 32], sizes = [2, 1], strides = [1, 1]} : vector<2x33xf32> to vector<2x1xf32>
    %c0_1 = arith.constant 0 : index
    %c0_2 = arith.constant 0 : index
    %4 = vector.load %arg1[%c0_1, %c0_2] : memref<33x32xf32, #tpu.memory_space<vmem>>, vector<33x32xf32>
    %cst = arith.constant dense<0.000000e+00> : vector<2x32xf32>
    %5 = tpu.matmul %0, %4, %cst {dimension_numbers = #tpu.dot_dimension_numbers<[1], [0], [0], [1], [0, 0, 1, 1], [], []>} : vector<2x33xf32>, vector<33x32xf32>, vector<2x32xf32> -> vector<2x32xf32>
    %6 = vector.extract_strided_slice %5 {offsets = [0, 0], sizes = [2, 16], strides = [1, 1]} : vector<2x32xf32> to vector<2x16xf32>
    %7 = vector.extract_strided_slice %5 {offsets = [0, 16], sizes = [2, 16], strides = [1, 1]} : vector<2x32xf32> to vector<2x16xf32>
    %8 = vector.extract_strided_slice %7 {offsets = [0, 0], sizes = [1, 16], strides = [1, 1]} : vector<2x16xf32> to vector<1x16xf32>
    %9 = vector.extract_strided_slice %7 {offsets = [1, 0], sizes = [1, 16], strides = [1, 1]} : vector<2x16xf32> to vector<1x16xf32>
    %10 = tpu.concatenate %8, %9 in 1 : vector<1x16xf32>, vector<1x16xf32> -> vector<1x32xf32>
    %11 = tpu.iota {dimensions = array<i32: 0>} : vector<32x16xi32>
    %12 = tpu.iota {dimensions = array<i32: 1>} : vector<32x16xi32>
    %c2_i32 = arith.constant 2 : i32
    %13 = vector.broadcast %c2_i32 : i32 to vector<32x16xi32>
    %14 = arith.muli %12, %13 : vector<32x16xi32>
    %c0_i32 = arith.constant 0 : i32
    %15 = vector.broadcast %c0_i32 : i32 to vector<32x16xi32>
    %16 = arith.addi %14, %15 : vector<32x16xi32>
    %17 = arith.cmpi eq, %11, %16 : vector<32x16xi32>
    %18 = arith.extui %17 : vector<32x16xi1> to vector<32x16xi32>
    %19 = arith.sitofp %18 : vector<32x16xi32> to vector<32x16xf32>
    %cst_3 = arith.constant dense<0.000000e+00> : vector<1x16xf32>
    %20 = tpu.matmul %10, %19, %cst_3 {dimension_numbers = #tpu.dot_dimension_numbers<[1], [0], [0], [1], [0, 0, 1, 1], [], []>} : vector<1x32xf32>, vector<32x16xf32>, vector<1x16xf32> -> vector<1x16xf32>
    %c2_i32_4 = arith.constant 2 : i32
    %21 = vector.broadcast %c2_i32_4 : i32 to vector<32x16xi32>
    %22 = arith.muli %12, %21 : vector<32x16xi32>
    %c1_i32 = arith.constant 1 : i32
    %23 = vector.broadcast %c1_i32 : i32 to vector<32x16xi32>
    %24 = arith.addi %22, %23 : vector<32x16xi32>
    %25 = arith.cmpi eq, %11, %24 : vector<32x16xi32>
    %26 = arith.extui %25 : vector<32x16xi1> to vector<32x16xi32>
    %27 = arith.sitofp %26 : vector<32x16xi32> to vector<32x16xf32>
    %cst_5 = arith.constant dense<0.000000e+00> : vector<1x16xf32>
    %28 = tpu.matmul %10, %27, %cst_5 {dimension_numbers = #tpu.dot_dimension_numbers<[1], [0], [0], [1], [0, 0, 1, 1], [], []>} : vector<1x32xf32>, vector<32x16xf32>, vector<1x16xf32> -> vector<1x16xf32>
    %29 = tpu.concatenate %20, %28 in 0 : vector<1x16xf32>, vector<1x16xf32> -> vector<2x16xf32>
    %cst_6 = arith.constant -0.102088533 : f32
    %30 = vector.broadcast %cst_6 : f32 to vector<2x16xf32>
    %31 = arith.addf %29, %30 : vector<2x16xf32>
    %cst_7 = arith.constant 8.000000e+00 : f32
    %32 = vector.broadcast %cst_7 : f32 to vector<2x16xf32>
    %33 = arith.mulf %32, %1 : vector<2x16xf32>
    %cst_8 = arith.constant 1.000000e+00 : f32
    %34 = vector.broadcast %cst_8 : f32 to vector<2x16xf32>
    %35 = arith.subf %34, %1 : vector<2x16xf32>
    %36 = arith.mulf %33, %35 : vector<2x16xf32>
    %37 = vector.broadcast %3 : vector<2x1xf32> to vector<2x16xf32>
    %38 = arith.subf %1, %37 : vector<2x16xf32>
    %39 = arith.mulf %36, %38 : vector<2x16xf32>
    %40 = arith.addf %6, %39 : vector<2x16xf32>
    %41 = arith.subf %40, %31 : vector<2x16xf32>
    %cst_9 = arith.constant 8.000000e+00 : f32
    %42 = vector.broadcast %cst_9 : f32 to vector<2x16xf32>
    %43 = arith.mulf %42, %1 : vector<2x16xf32>
    %44 = vector.broadcast %3 : vector<2x1xf32> to vector<2x16xf32>
    %45 = arith.subf %1, %44 : vector<2x16xf32>
    %cst_10 = arith.constant 1.000000e+00 : f32
    %46 = vector.broadcast %cst_10 : f32 to vector<2x16xf32>
    %47 = arith.subf %45, %46 : vector<2x16xf32>
    %48 = arith.mulf %43, %47 : vector<2x16xf32>
    %49 = arith.addf %48, %2 : vector<2x16xf32>
    %cst_11 = arith.constant -0.00999999977 : f32
    %50 = vector.broadcast %cst_11 : f32 to vector<2x16xf32>
    %51 = arith.mulf %50, %49 : vector<2x16xf32>
    %cst_12 = arith.constant 0.000000e+00 : f32
    %52 = vector.broadcast %cst_12 : f32 to vector<2x1xf32>
    %53 = tpu.concatenate %41, %51, %52 in 1 : vector<2x16xf32>, vector<2x16xf32>, vector<2x1xf32> -> vector<2x33xf32>
    %c0_13 = arith.constant 0 : index
    %c0_14 = arith.constant 0 : index
    %54 = vector.load %arg2[%c0_13, %c0_14] : memref<2x33xf32, #tpu.memory_space<vmem>>, vector<2x33xf32>
    tpu.vector_store %arg2[%c0_13, %c0_14], %53 {strides = array<i32>} : memref<2x33xf32, #tpu.memory_space<vmem>>, vector<2x33xf32>,
    return
  }
}

</mosaic_0001>

<bundles_post_ra>
// kernel: tpu_custom_call.1
= control target key start
LH: loop header
LB: loop body
LE: loop exit
PB: predicated region body
PF: predicated region fallthrough
CT: control target
= control target key end

     0   :  { %v449_v3 = vmov 0.0|0.0   ;;  %vm450_vm0 = vmmov 0   ;;  %v451_v6 = vmov 0.0   ;;  %s512_s0 = inlined_call_operand.vmem [shape: f32[2,33], index: 0, kind: input, shape index: {}]   ;;  %s513_s1 = inlined_call_operand.vmem [shape: f32[33,32], index: 1, kind: input, shape index: {}]   ;;  %s514_s2 = inlined_call_operand.hbm [shape: f32[2,33], index: 2, kind: output, shape index: {}]  }
   0x1   :  { %v13_v0 = vld [vmem:[%s513_s1] sm:$0xff]  ;;  %v14_v1 = vld [vmem:[%s513_s1 + $0x8] sm:$0xff]  ;;  %v15_v2 = vld [vmem:[%s513_s1 + $0x10] sm:$0xff]  ;;  %398 = vmatprep.subr.bf16.mxu0 %v449_v3  ;;  %404 = vmatprep.subr.bf16.mxu1 %v449_v3 }
   0x2   :  { %v399_v4 = vpack.c.bf16 %v14_v1, %v13_v0  ;;  %v16_v5 = vld [vmem:[%s513_s1 + $0x18] sm:$0xff]  ;;  %373 = vmatprep.mubr.msk.f32.mxu0 %vm450_vm0, %v451_v6  ;;  %384 = vmatprep.mubr.msk.f32.mxu1 %vm450_vm0, %v451_v6 }
   0x3   :  { %7 = vsyncpa [#allocation3], 0  ;;  %v402_v7 = vpack.c.bf16 %v16_v5, %v15_v2  ;;  %v17_v8 = vld [vmem:[%s513_s1 + $0x20] sm:$0x1]  ;;  %vm22_vm1 = vcmask 1040384   ;;  %vm18_vm2 = vcmask 269312   ;;  %v104_v11 = vlaneseq }
   0x4   :  { %400 = vmatpush3.bf16.msra.mxu0 %v399_v4  ;;  %v12_v9 = vld [vmem:[%s512_s0] sm:$0x3]  ;;  %s452_s21 = smov 112   ;;  %v453_v10 = vmov 32   ;;  %v454_v18 = vmov 1.0|1.0  }
   0x5   :  { %401 = vmatprep.subr.bf16.mxu0 %v449_v3  ;;  %299 = vrot.lane.b32.xlu1 %v12_v9, %s452_s21  ;;  %v105_v12 = vshrl.u32 %v104_v11, 7  ;;  %v110_v13 = vand.u32 127, %v104_v11  ;;  %vm102_vm11 = vcmask 130048   ;;  %vm124_vm12 = vcmask 261120   ;;  %s455_s0 = smov 16   ;;  %s456_s1 = smov [#allocation2]  }
   0x6   :  { %424 = vset.pattern.permute.xlu0 %v453_v10  ;;  %v286_v25 = vmul.f32 8.0, %v12_v9  ;;  %v287_v26 = vsub.f32 1.0, %v12_v9  ;;  %s318_s22 = sshll.u32 %s456_s1, 4  ;;  %s319_s22 = int_to_ptr.vmem [resolvable:$true] %s318_s22 }
   0x7   :  { %v106_v14 = vadd.s32 8, %v105_v12  ;;  %v111_v15 = vmul.u32 2, %v110_v13  ;;  %v107_v16 = vadd.s32 16, %v105_v12  ;;  %v108_v17 = vadd.s32 24, %v105_v12  ;;  %s425_s23 = scalar_lea.vmem %s319_s22, 32  ;;  %p430_p1 = scmp.lt.s32.totalorder %s319_s22, %s319_s22 }
   0x8   :  { %403 = vmatpush3.bf16.msra.mxu0 %v402_v7  ;;  %v288_v27 = vmul.f32 %v287_v26, %v286_v25  ;;  %p426_p0 = scmp.ne.s32.totalorder %s319_s22, %s425_s23  ;;  %p431_p2 = scmp.lt.s32.totalorder %s425_s23, %s425_s23 }
   0x9   :  { %371 = vmatprep.subr.mxu0 %v451_v6  ;;  %vm112_vm3 = vcmp.eq.s32.totalorder %v105_v12, %v111_v15  ;;  %vm113_vm4 = vcmp.eq.s32.totalorder %v106_v14, %v111_v15  ;;  %vm114_vm5 = vcmp.eq.s32.totalorder %v107_v16, %v111_v15  ;;  %vm115_vm6 = vcmp.eq.s32.totalorder %v108_v17, %v111_v15 }
   0xa   :  { %vm405_vm7 = vmpackc.low %vm113_vm4, %vm112_vm3  ;;  %v198_v21 = vadd.s32 1, %v111_v15  ;;  %p432_p3 = por %p431_p2, %p430_p1 }
   0xb   :  { %406 = vmatpush3.bf16.msk.msra.mxu1 %vm405_vm7, %v454_v18  ;;  %vm408_vm8 = vmpackc.low %vm115_vm6, %vm114_vm5 }
   0xc   :  { %372 = vmatpush3.msk.msra.mxu0 %vm22_vm1, %v17_v8  ;;  %407 = vmatprep.subr.bf16.mxu1 %v449_v3  ;;  %vm199_vm9 = vcmp.eq.s32.totalorder %v105_v12, %v198_v21  ;;  %vm200_vm10 = vcmp.eq.s32.totalorder %v106_v14, %v198_v21  ;;  %vm201_vm14 = vcmp.eq.s32.totalorder %v107_v16, %v198_v21  ;;  %p433_p4 = pnand %p432_p3, %p426_p0 }
   0xd   :  { %374 = vmatmul.mubr.msk.f32.vlgmr.msra.gmra.mrb[0].mxu0 %vm18_vm2, %v12_v9  ;;  %vm411_vm13 = vmpackc.low %vm200_vm10, %vm199_vm9  ;;  %vm202_vm15 = vcmp.eq.s32.totalorder %v108_v17, %v198_v21 }
   0xe   :  { %vm414_vm2 = vmpackc.low %vm202_vm15, %vm201_vm14 }
   0xf   :  { %409 = vmatpush3.bf16.msk.msra.mxu1 %vm408_vm8, %v454_v18 }
  0x10   :  { %410 = vmatprep.subr.bf16.mxu1 %v449_v3 }
  0x77   :  { %v300_v32 = vpop.permute.xlu1 %299 }
  0xe0   :  { %v92_v19 = vpop.f32.mrb[0].mxu0 }
  0xe1   :  { %97 = vrot.lane.b32.xlu0 %v92_v19, %s452_s21  ;;  %v375_v20 = vpop.f32.mrb[1].mxu0  ;;  %v100_v22 = vrot.slane %v92_v19, 1 }
  0xe5   :  { %290 = vperm.xlu0 %424, %v12_v9  }
 0x153   :  { %v98_v23 = vpop.permute.xlu0 %97 }
 0x154   :  { %v103_v24 = vsel %vm102_vm11, %v98_v23, %v100_v22 }
 0x155   :  { %385 = vmatmul.mubr.msk.f32.vlgmr.msra.gmra.mrb[0].mxu1 %vm124_vm12, %v103_v24 }
 0x156   :  { %412 = vmatpush3.bf16.msk.msra.mxu1 %vm411_vm13, %v454_v18  ;;  %395 = vmatprep.mubr.msk.f32.mxu1 %vm450_vm0, %v451_v6  ;;  %vm310_vm0 = vcmask 263168  }
 0x157   :  { %413 = vmatprep.subr.bf16.mxu1 %v449_v3 }
 0x15a   :  { %415 = vmatpush3.bf16.msk.msra.mxu1 %vm414_vm2, %v454_v18 }
 0x15d   :  { %396 = vmatmul.mubr.msk.f32.vlgmr.msra.gmra.mrb[2].mxu1 %vm124_vm12, %v103_v24 }
 0x164   :  { %v291_v28 = vpop.permute.xlu0 %290 }
 0x165   :  { %v293_v29 = vsub.f32 %v12_v9, %v291_v28 }
 0x167   :  { %v294_v30 = vmul.f32 %v293_v29, %v288_v27  ;;  %v346_v31 = vadd.f32 -1.0, %v293_v29 }
 0x169   :  { %v295_v33 = vadd.f32 %v294_v30, %v92_v19  ;;  %v298_v34 = vmul.f32 %v346_v31, %v286_v25 }
 0x16b   :  { %v302_v35 = vadd.f32 %v300_v32, %v298_v34 }
 0x16d   :  { %v303_v36 = vmul.f32 -0.01, %v302_v35 }
 0x16f   :  { %305 = vrot.lane.b32.xlu1 %v303_v36, %s455_s0 }
 0x1e1   :  { %v306_v44 = vpop.permute.xlu1 %305 }
 0x228   :  { %v194_v37 = vpop.f32.mrb[0].mxu1 }
 0x229   :  { %v386_v38 = vpop.f32.mrb[1].mxu1 }
 0x230   :  { %v277_v39 = vpop.f32.mrb[2].mxu1 }
 0x231   :  { %v282_v40 = vrot.slane %v277_v39, 7  ;;  %v397_v41 = vpop.f32.mrb[3].mxu1 }
 0x233   :  { %v284_v42 = vsel %vm22_vm1, %v194_v37, %v282_v40 }
 0x234   :  { %v285_v43 = vadd.f32 -0.10208853, %v284_v42 }
 0x236   :  { %v296_v45 = vsub.f32 %v295_v33, %v285_v43 }
 0x238   :  { %v308_v46 = vsel %vm102_vm11, %v296_v45, %v306_v44 }
 0x239   :  { %v309_v47 = vsel %vm124_vm12, %v308_v46, 0.0 }
 0x23a   :  { %311 = vst.msk [vmem:[#allocation2] sm:$0x3] %vm310_vm0, %v309_v47 }
 0x23b   :  { %436 = shalt.err (!%p433_p4)
}
 0x23c   :  { %s437_s26 = scalar_lea.hbm %s514_s2, 32 }
 0x23d   :  { %p438_p5 = scmp.ne.s32.totalorder %s514_s2, %s437_s26  ;;  %p441_p6 = scmp.lt.u32.totalorder %s437_s26, %s514_s2 }
 0x23f   :  { %p443_p7 = pnand %p441_p6, %p438_p5 }
 0x241   :  { %446 = shalt.err (!%p443_p7)
}
 0x242   :  { %321 = dma.vmem_to_hbm [thread:$0]  %s319_s22, 32, %s514_s2, [#allocation3]  }
 0x243   :  { %447 = dma.done.wait [#allocation3], 32  }
 0x244   :  { %448 = vsyncadd [#allocation3], 4294967264 }
 0x245   :  { %325 = vsyncpa [#allocation3], 1 }

</bundles_post_ra>
